<compile_context>
chip_gen: v7x
topology: tpu7x:2x2x1
jax: 0.10.0
libtpu: 0.0.40
codegen_flags: <defaults>
</compile_context>

<pallas_src>
import math

import jax
import jax.numpy as jnp
from jax.experimental import pallas as pl
from jax.experimental.pallas import tpu as pltpu


def _make_scaling_kernel(sign):
    def kernel(x_ref, s_ref, y_ref):
        # Multiplier: (1, Dd) row, EUP exp, broadcast over the tile's rows.
        m = jnp.exp(sign * s_ref[...].astype(jnp.float32))
        y_ref[...] = (x_ref[...] * m).astype(y_ref.dtype)
    return kernel


def _pick_tile_rows(Dd, itemsize, Bd):
    # 2 (double-buffer) x 2 (input + output) blocks dominate VMEM usage.
    budget = 12 * 1024 * 1024           # fits inside every gen's scoped VMEM
    tb = budget // (4 * Dd * itemsize)
    tb = max(8, (tb // 8) * 8)          # sublane multiple
    tb = min(tb, 1024)                  # amortization plateaus ~512-1024 rows
    tb = min(tb, ((Bd + 7) // 8) * 8)   # don't exceed (rounded-up) batch
    return int(tb)


def scaling_forward(x, scale, reverse=False):
    """Pallas equivalent of Scaling.forward.

    x:     (B, ...) input with prod(x.shape[1:]) == scale.size
    scale: (1, dim) or (1, d0, d1) parameter
    returns (y, log_det_J) with y.shape == x.shape, log_det_J scalar.
    """
    orig_shape = x.shape
    B = int(x.shape[0])
    D = int(scale.size)
    assert math.prod(x.shape[1:]) == D, (
        f"trailing dims of x {x.shape[1:]} do not match scale size {D}")

    sign = -1.0 if reverse else 1.0
    log_det_J = jnp.sum(scale)                       # tiny, independent of x

    x2 = x.reshape(B, D)
    s2 = scale.reshape(1, D)

    # ---- lane-densify via a free (contiguous) row-fold when possible ----
    fold = math.lcm(D, 128) // D
    if fold > 1 and (B % fold == 0) and (D * fold <= 65536):
        Bd, Dd = B // fold, D * fold
        xd = x2.reshape(Bd, Dd)                      # contiguous -> no copy
        sd = jnp.tile(s2, (1, fold))                 # (1, Dd), tiny
    else:
        fold = 1
        Bd, Dd = B, D                                # full-extent last dim
        xd, sd = x2, s2

    tb = _pick_tile_rows(Dd, jnp.dtype(x.dtype).itemsize, Bd)
    n_tiles = pl.cdiv(Bd, tb)                        # last block may be partial

    yd = pl.pallas_call(
        _make_scaling_kernel(sign),
        out_shape=jax.ShapeDtypeStruct((Bd, Dd), x.dtype),
        grid=(n_tiles,),
        in_specs=[
            pl.BlockSpec((tb, Dd), lambda i: (i, 0)),   # streamed x tiles
            pl.BlockSpec((1, Dd), lambda i: (0, 0)),    # resident scale row
        ],
        out_specs=pl.BlockSpec((tb, Dd), lambda i: (i, 0)),
        compiler_params=pltpu.CompilerParams(
            dimension_semantics=("parallel",),          # megacore / 2-TC split
            vmem_limit_bytes=32 * 1024 * 1024,
        ),
    )(xd, sd)

    y = yd.reshape(B, D) if fold > 1 else yd
    return y.reshape(orig_shape), log_det_J


class ScalingPallas:
    """Deterministically-initialized stand-in for the nn.Module (scale = zeros)."""

    def __init__(self, dim):
        if isinstance(dim, (list, tuple)):
            self.scale = jnp.zeros((1, dim[0], dim[1]), dtype=jnp.float32)
        else:
            self.scale = jnp.zeros((1, dim), dtype=jnp.float32)

    def __call__(self, x, reverse=False):
        return scaling_forward(x, self.scale, reverse=reverse)


def _check(x, scale, reverse):
    y, ld = scaling_forward(x, scale, reverse=reverse)
    y = jax.block_until_ready(y)
    ld = jax.block_until_ready(ld)
    sign = -1.0 if reverse else 1.0
    y_ref = x * jnp.exp(sign * scale)
    ld_ref = jnp.sum(scale)
    assert y.shape == x.shape
    assert jnp.allclose(y, y_ref, atol=1e-5, rtol=1e-5)
    assert jnp.allclose(ld, ld_ref, atol=1e-5, rtol=1e-5)


if __name__ == "__main__":
    key = jax.random.PRNGKey(0)
    k1, k2, k3, k4 = jax.random.split(key, 4)

    # Case 1: int dim, fold path (B=8, D=32 -> (2, 128) lane-dense)
    B1, D1 = 8, 32
    x1 = jax.random.normal(k1, (B1, D1), dtype=jnp.float32)
    mod1 = ScalingPallas(D1)
    mod1.scale = 0.1 * jnp.arange(D1, dtype=jnp.float32).reshape(1, D1) / D1
    _check(x1, mod1.scale, reverse=False)
    _check(x1, mod1.scale, reverse=True)

    # Case 2: list dim, fold path (B=2, dim=[4,16] -> D=64 -> (1, 128))
    x2 = jax.random.normal(k2, (2, 4, 16), dtype=jnp.float32)
    mod2 = ScalingPallas([4, 16])
    mod2.scale = 0.05 * jax.random.normal(k3, (1, 4, 16), dtype=jnp.float32)
    _check(x2, mod2.scale, reverse=False)
    _check(x2, mod2.scale, reverse=True)

    # Case 3: already lane-dense (D=256)
    x3 = jax.random.normal(k4, (2, 256), dtype=jnp.float32)
    mod3 = ScalingPallas(256)
    mod3.scale = 0.01 * jnp.arange(256, dtype=jnp.float32).reshape(1, 256) / 256
    _check(x3, mod3.scale, reverse=False)

    # Case 4: non-foldable, non-128-multiple D (full-extent last block dim)
    x4 = jax.random.normal(k1, (2, 48), dtype=jnp.float32)
    mod4 = ScalingPallas(48)
    mod4.scale = 0.2 * jnp.ones((1, 48), dtype=jnp.float32)
    _check(x4, mod4.scale, reverse=True)

    print("KERNEL_OK")
</pallas_src>

<mosaic_0001>
module attributes {stable_mosaic.version = 11 : i64} {
  func.func @kernel(%arg0: i32, %arg1: memref<8x128xf32, #tpu.memory_space<vmem>>, %arg2: memref<1x128xf32, #tpu.memory_space<vmem>>, %arg3: memref<8x128xf32, #tpu.memory_space<vmem>>) attributes {dimension_semantics = [#tpu.dimension_semantics<parallel>], iteration_bounds = array<i64: 1>, scalar_prefetch = 0 : i64, scratch_operands = 0 : i64, tpu.core_type = #tpu.core_type<tc>, window_params = [{transform_indices = @transform_0, window_bounds = array<i64: 8, 128>}, {pipeline_mode = #tpu.pipeline_mode<synchronous>, transform_indices = @transform_1, window_bounds = array<i64: 1, 128>}, {transform_indices = @transform_2, window_bounds = array<i64: 8, 128>}]} {
    %c0 = arith.constant 0 : index
    %c0_0 = arith.constant 0 : index
    %0 = vector.load %arg2[%c0, %c0_0] : memref<1x128xf32, #tpu.memory_space<vmem>>, vector<1x128xf32>
    %cst = arith.constant 1.000000e+00 : f32
    %1 = vector.broadcast %cst : f32 to vector<1x128xf32>
    %2 = arith.mulf %1, %0 : vector<1x128xf32>
    %3 = math.exp %2 : vector<1x128xf32>
    %c0_1 = arith.constant 0 : index
    %c0_2 = arith.constant 0 : index
    %4 = vector.load %arg1[%c0_1, %c0_2] : memref<8x128xf32, #tpu.memory_space<vmem>>, vector<8x128xf32>
    %5 = vector.broadcast %3 : vector<1x128xf32> to vector<8x128xf32>
    %6 = arith.mulf %4, %5 : vector<8x128xf32>
    %c0_3 = arith.constant 0 : index
    %c0_4 = arith.constant 0 : index
    %7 = vector.load %arg3[%c0_3, %c0_4] : memref<8x128xf32, #tpu.memory_space<vmem>>, vector<8x128xf32>
    tpu.vector_store %arg3[%c0_3, %c0_4], %6 {strides = array<i32>} : memref<8x128xf32, #tpu.memory_space<vmem>>, vector<8x128xf32>,
    return
  }
  func.func @transform_0(%arg0: i32) -> (i32, i32) {
    %c0_i32 = arith.constant 0 : i32
    %c0_i32_0 = arith.constant 0 : i32
    return %arg0, %c0_i32 : i32, i32
  }
  func.func @transform_1(%arg0: i32) -> (i32, i32) {
    %c0_i32 = arith.constant 0 : i32
    %c0_i32_0 = arith.constant 0 : i32
    %c0_i32_1 = arith.constant 0 : i32
    return %c0_i32, %c0_i32_0 : i32, i32
  }
  func.func @transform_2(%arg0: i32) -> (i32, i32) {
    %c0_i32 = arith.constant 0 : i32
    %c0_i32_0 = arith.constant 0 : i32
    return %arg0, %c0_i32 : i32, i32
  }
}

</mosaic_0001>

<bundles_post_ra>
// kernel: tpu_custom_call.1
= control target key start
LH: loop header
LB: loop body
LE: loop exit
PB: predicated region body
PF: predicated region fallthrough
CT: control target
= control target key end

     0   :  { %7 = vsyncpa [#allocation3], 0  ;;  %s161_s0 = inlined_call_operand.hbm [shape: f32[2,128], index: 0, kind: input, shape index: {}]   ;;  %s162_s1 = inlined_call_operand.vmem [shape: f32[1,128], index: 1, kind: input, shape index: {}]   ;;  %s163_s2 = inlined_call_operand.hbm [shape: f32[2,128], index: 2, kind: output, shape index: {}]  }
   0x1   :  { %8 = vsyncpa [#allocation4], 0 }
   0x2   :  { %13 = vsyncadd [#allocation3], 96  ;;  %s109_s9 = smov [#allocation2]   ;;  %s61_s13 = scalar_lea.hbm %s161_s0, 32 }
   0x3   :  { %s14_s10 = sshll.u32 %s109_s9, 4  ;;  %p62_p0 = scmp.ne.s32.totalorder %s161_s0, %s61_s13  ;;  %s15_s10 = int_to_ptr.vmem [resolvable:$true] %s14_s10 }
   0x4   :  { %p65_p1 = scmp.lt.u32.totalorder %s61_s13, %s161_s0 }
   0x6   :  { %p67_p2 = pnand %p65_p1, %p62_p0 }
   0x8   :  { %70 = shalt.err (!%p67_p2)
}
   0x9   :  { %s71_s18 = scalar_lea.vmem %s15_s10, 32  ;;  %s75_s19 = scalar_lea.vmem %s15_s10, 128 }
   0xa   :  { %p72_p3 = scmp.ne.s32.totalorder %s15_s10, %s71_s18  ;;  %p76_p4 = scmp.lt.s32.totalorder %s15_s10, %s15_s10 }
   0xb   :  { %p77_p5 = scmp.lt.s32.totalorder %s75_s19, %s71_s18 }
   0xd   :  { %p78_p6 = por %p77_p5, %p76_p4 }
   0xf   :  { %p79_p7 = pnand %p78_p6, %p72_p3 }
  0x11   :  { %82 = shalt.err (!%p79_p7)
}
  0x12   :  { %s110_s20 = smov 32   ;;  %s111_s21 = smov 2  }
  0x13   :  { %20 = dma.hbm_to_vmem [thread:$0]  %s161_s0, 32, %s15_s10, [#allocation3], %s110_s20, %s110_s20, %s111_s21  }
  0x14   :  { %105 = dma.done.wait [#allocation3], 128  }
  0x15   :  { %106 = vsyncadd [#allocation3], 4294967168  ;;  %v26_v0 = vld [vmem:[%s162_s1] sm:$0x1]  ;;  %v31_v2 = vlaneseq }
  0x16   :  { %v27_v1 = vmul.f32 1.442695, %v26_v0  ;;  %v29_v6 = vld [vmem:[#allocation2] sm:$0xff] }
  0x17   :  { %v32_v3 = vshrl.u32 %v31_v2, 7 }
  0x18   :  { %59 = vpow2.f32 %v27_v1 }
  0x19   :  { %v33_v4 = vsub.s32 0, %v32_v3 }
  0x22   :  { %v60_v5 = vpop.eup %59 }
  0x23   :  { %v34_v7 = vrot.slane %v60_v5, %v33_v4 }
  0x25   :  { %v36_v8 = vmul.f32 %v34_v7, %v29_v6 }
  0x27   :  { %37 = vst [vmem:[#allocation5] sm:$0xff] %v36_v8 }
  0x28   :  { %42 = vsyncadd [#allocation4], 96  ;;  %s112_s26 = smov [#allocation5]  }
  0x29   :  { %s43_s27 = sshll.u32 %s112_s26, 4  ;;  %s44_s27 = int_to_ptr.vmem [resolvable:$true] %s43_s27 }
  0x2a   :  { %s83_s0 = scalar_lea.vmem %s44_s27, 32  ;;  %s87_s28 = scalar_lea.vmem %s44_s27, 128 }
  0x2b   :  { %p84_p8 = scmp.ne.s32.totalorder %s44_s27, %s83_s0  ;;  %p88_p9 = scmp.lt.s32.totalorder %s44_s27, %s44_s27 }
  0x2c   :  { %p89_p10 = scmp.lt.s32.totalorder %s87_s28, %s83_s0 }
  0x2e   :  { %p90_p11 = por %p89_p10, %p88_p9 }
  0x30   :  { %p91_p12 = pnand %p90_p11, %p84_p8 }
  0x32   :  { %94 = shalt.err (!%p91_p12)
}
  0x33   :  { %s95_s30 = scalar_lea.hbm %s163_s2, 32 }
  0x34   :  { %p96_p13 = scmp.ne.s32.totalorder %s163_s2, %s95_s30  ;;  %p99_p0 = scmp.lt.u32.totalorder %s95_s30, %s163_s2 }
  0x36   :  { %p101_p1 = pnand %p99_p0, %p96_p13 }
  0x38   :  { %104 = shalt.err (!%p101_p1)
}
  0x39   :  { %49 = dma.vmem_to_hbm [thread:$0]  %s44_s27, 32, %s163_s2, [#allocation4], %s110_s20, %s110_s20, %s111_s21  }
  0x3a   :  { %107 = dma.done.wait [#allocation4], 128  }
  0x3b   :  { %108 = vsyncadd [#allocation4], 4294967168 }
  0x3c   :  { %53 = vsyncpa [#allocation3], 1 }
  0x3d   :  { %54 = vsyncpa [#allocation4], 1 }

</bundles_post_ra>
